<compile_context>
chip_gen: v6e
topology: v6e:2x2x1
jax: 0.10.0
libtpu: 0.0.40
codegen_flags: <defaults>
</compile_context>

<pallas_src>
import functools
import math
import random

import jax
import jax.numpy as jnp
from jax import lax
from jax.experimental import pallas as pl
from jax.experimental.pallas import tpu as pltpu

_LANES = 128
_TARGET_BLOCK_BYTES = 8 << 20   # ~8 MiB of input per grid step (review: 4-8 MiB)
_MAX_SLICES = 384               # cap on the in-kernel unrolled slice count
_MAX_ROWS = 64                  # images folded per block (keeps partial <= 8 f32 vregs)
_VMEM_LIMIT = 40 << 20          # 2x8 MiB double-buffered input + scratch, <=48 MiB (v7x)


def _round_up(x, m):
    return (x + m - 1) // m * m


def _round_down(x, m):
    return x // m * m


def _brightness_kernel(x_ref, o_ref, acc_ref, *, bk, slice_w, kb_per_split,
                       k_true, inv_count, needs_mask):
    """One grid step of the streamed brightness reduction.

    x_ref:   (tn, bk)       native-dtype block of the flattened images
    o_ref:   (1, tn, 128)   lane-dense output block (one K-split partial mean)
    acc_ref: (tn, slice_w)  resident f32 lane-wise partial-sum accumulator
    """
    s = pl.program_id(1)                      # K-split index
    j = pl.program_id(2)                      # reduction step within the split
    tn = acc_ref.shape[0]
    nslices = bk // slice_w

    @pl.when(j == 0)
    def _init():
        acc_ref[...] = jnp.zeros_like(acc_ref)

    # Element offset of this block along the flattened (C*H*W) axis.
    block_start = (s * kb_per_split + j) * bk

    def accumulate(masked):
        # Streaming cast+add (pure VPU): static 128-aligned slices of the block
        # fold into a vreg-resident partial; one VMEM accumulate per step.
        if masked:
            lane = lax.broadcasted_iota(jnp.int32, (tn, slice_w), 1)

        def load_slice(t):
            chunk = x_ref[:, t * slice_w:(t + 1) * slice_w].astype(jnp.float32)
            if masked:
                limit = k_true - block_start - t * slice_w   # traced scalar
                chunk = jnp.where(lane < limit, chunk, 0.0)
            return chunk

        partial = load_slice(0)
        for t in range(1, nslices):
            partial = partial + load_slice(t)
        acc_ref[...] += partial

    if needs_mask:
        # Only the tail / fully-out-of-range blocks pay for the mask.
        is_tail = block_start + bk > k_true

        @pl.when(jnp.logical_not(is_tail))
        def _interior():
            accumulate(False)

        @pl.when(is_tail)
        def _tail():
            accumulate(True)
    else:
        accumulate(False)

    @pl.when(j == pl.num_programs(2) - 1)
    def _finalize():
        # Single cross-lane (XLU) fold per output block, then scale.
        total = jnp.sum(acc_ref[...], axis=1, keepdims=True)        # (tn, 1)
        o_ref[...] = jnp.broadcast_to((total * inv_count)[None], o_ref.shape)


def _tile_sizes(n, k, itemsize):
    """Pick (tn, bk, slice_w): rows per block, lanes per block, in-kernel slice."""
    sub = max(8, 32 // itemsize)              # native sublane packing: f32:8, bf16:16, u8:32
    k_lanes = _round_up(k, _LANES)
    row_bytes = k_lanes * itemsize

    if sub * row_bytes >= _TARGET_BLOCK_BYTES:
        tn = sub                              # big-image regime: stream K, minimal rows
    else:
        # Small-image regime: fold more images per block so per-step DMA isn't tiny.
        tn = max(sub, _round_down(min(_MAX_ROWS, _TARGET_BLOCK_BYTES // row_bytes), sub))
        tn = min(tn, max(sub, _round_up(n, sub)))

    # Slice width such that one widened f32 slice is ~8 vregs (32 KiB).
    slice_w = max(_LANES, _round_down(8192 // tn, _LANES))

    bk_cap = max(slice_w, _round_down(
        min(_TARGET_BLOCK_BYTES // (tn * itemsize), _MAX_SLICES * slice_w), slice_w))
    bk = min(_round_up(k, slice_w), bk_cap)
    return tn, bk, slice_w


def _brightness_impl(image_tensor):
    """mean over (C, H, W) per image -> (N, 1) float32, via a Pallas streamed reduction."""
    n = image_tensor.shape[0]
    k = math.prod(image_tensor.shape[1:])
    itemsize = image_tensor.dtype.itemsize

    tn, bk, slice_w = _tile_sizes(n, k, itemsize)
    n_tiles = pl.cdiv(n, tn)
    num_kb = pl.cdiv(k, bk)
    # Split the reduction into 2 "parallel" partials when the batch axis alone
    # can't occupy both v7x TensorCores; harmless (sequential) on 1-TC chips.
    ksplit = 2 if (n_tiles == 1 and num_kb >= 4) else 1
    kb_per_split = pl.cdiv(num_kb, ksplit)
    needs_mask = (ksplit * kb_per_split * bk) != k

    flat = image_tensor.reshape(n, k)         # free view of contiguous NCHW; no pad/copy

    kernel = functools.partial(
        _brightness_kernel, bk=bk, slice_w=slice_w, kb_per_split=kb_per_split,
        k_true=k, inv_count=1.0 / float(k), needs_mask=needs_mask)

    def x_index_map(i, s, j):
        # Clamp so edge / over-split blocks still DMA in-bounds data; the kernel
        # masks their contribution to zero.
        kb = jnp.minimum(s * kb_per_split + j, num_kb - 1)
        return (i, kb)

    out = pl.pallas_call(
        kernel,
        out_shape=jax.ShapeDtypeStruct((ksplit, n_tiles * tn, _LANES), jnp.float32),
        grid_spec=pltpu.PrefetchScalarGridSpec(
            num_scalar_prefetch=0,
            grid=(n_tiles, ksplit, kb_per_split),     # reduction axis last
            # Default double-buffering; pl.Buffered(3) is an option on v7x if
            # DMA issue gaps show up after enlarging blocks (VMEM re-budgeted).
            in_specs=[pl.BlockSpec((tn, bk), x_index_map)],
            # Same output block across the reduction axis -> resident in VMEM.
            out_specs=pl.BlockSpec((1, tn, _LANES), lambda i, s, j: (s, i, 0)),
            scratch_shapes=[pltpu.VMEM((tn, slice_w), jnp.float32)],
        ),
        compiler_params=pltpu.CompilerParams(
            dimension_semantics=("parallel", "parallel", "arbitrary"),
            vmem_limit_bytes=_VMEM_LIMIT,
        ),
    )(flat)

    # Combine K-split partials (no-op when ksplit == 1) and drop padded rows.
    return jnp.sum(out[:, :n, 0], axis=0)[:, None]           # (N, 1)


calculate_brightness = jax.jit(_brightness_impl)


@jax.jit
def _brightness_flags(image_tensor, threshold):
    """Device-side threshold: the host sync only moves an (N,) bool vector."""
    b = _brightness_impl(image_tensor)
    return b[:, 0] >= threshold


class ImageFilter:
    """JAX/Pallas port of the PyTorch ImageFilter module."""

    def __init__(self, brightness_threshold=0.01):
        self.brightness_threshold = brightness_threshold

    def __call__(self, image_tensor):
        batch_size = image_tensor.shape[0]
        # TODO(synk): the module returns a Python list of indices built with
        # random.sample, so one device->host sync is inherent; it now moves
        # only an (N,) bool vector.
        flags = jax.device_get(
            _brightness_flags(image_tensor,
                              jnp.float32(self.brightness_threshold)))

        fraction_to_select = 1.0
        num_images_to_select = int(batch_size * fraction_to_select)

        bright = [i for i, f in enumerate(flags) if bool(f)]
        if len(bright) < num_images_to_select:
            selected = list(bright)
            need = num_images_to_select - len(bright)
            bright_set = set(bright)
            dark = [i for i in range(batch_size) if i not in bright_set]
            selected += random.sample(dark, need)
            return selected
        else:
            return random.sample(bright, num_images_to_select)


if __name__ == "__main__":
    random.seed(0)

    # 1) Module-scale input: batch=2, channels=4, 16x16 (one image forced dark).
    x = jax.random.uniform(jax.random.PRNGKey(0), (2, 4, 16, 16), dtype=jnp.float32)
    x = x.at[1].set(0.0)
    bvals = calculate_brightness(x)
    jax.block_until_ready(bvals)
    ref = jnp.mean(x, axis=(1, 2, 3)).reshape(-1, 1)
    assert jnp.allclose(bvals, ref, atol=1e-5, rtol=1e-5), (bvals, ref)

    # 2) Unaligned C*H*W (459 elems): exercises the in-kernel K-tail mask
    #    (the host-side jnp.pad copy is gone).
    x2 = jax.random.uniform(jax.random.PRNGKey(1), (3, 3, 17, 9), dtype=jnp.float32)
    b2 = calculate_brightness(x2)
    jax.block_until_ready(b2)
    ref2 = jnp.mean(x2, axis=(1, 2, 3)).reshape(-1, 1)
    assert jnp.allclose(b2, ref2, atol=1e-5, rtol=1e-5), (b2, ref2)

    # 3) Single larger image: exercises the multi-step streamed reduction, the
    #    K-split "parallel" axis, and clamped / fully-masked over-split blocks.
    x3 = jax.random.uniform(jax.random.PRNGKey(2), (1, 3, 640, 640), dtype=jnp.float32)
    b3 = calculate_brightness(x3)
    jax.block_until_ready(b3)
    ref3 = jnp.mean(x3, axis=(1, 2, 3)).reshape(-1, 1)
    assert jnp.allclose(b3, ref3, atol=1e-5, rtol=2e-4), (b3, ref3)

    filt = ImageFilter(brightness_threshold=0.01)
    selected = filt(x)
    assert sorted(selected) == list(range(x.shape[0]))

    print("KERNEL_OK")
</pallas_src>

<mosaic_0001>
module attributes {stable_mosaic.version = 11 : i64} {
  func.func @_brightness_kernel(%arg0: i32, %arg1: i32, %arg2: i32, %arg3: memref<8x1024xf32, #tpu.memory_space<vmem>>, %arg4: memref<1x8x128xf32, #tpu.memory_space<vmem>>, %arg5: memref<8x1024xf32, #tpu.memory_space<vmem>>) attributes {dimension_semantics = [#tpu.dimension_semantics<parallel>, #tpu.dimension_semantics<parallel>, #tpu.dimension_semantics<arbitrary>], iteration_bounds = array<i64: 1, 1, 1>, scalar_prefetch = 0 : i64, scratch_operands = 1 : i64, tpu.core_type = #tpu.core_type<tc>, window_params = [{transform_indices = @transform_0, window_bounds = array<i64: 8, 1024>}, {transform_indices = @transform_1, window_bounds = array<i64: 1, 8, 128>}]} {
    %c0_i32 = arith.constant 0 : i32
    %0 = arith.cmpi eq, %arg2, %c0_i32 : i32
    %1 = arith.extui %0 : i1 to i32
    %c0_i32_0 = arith.constant 0 : i32
    %2 = arith.cmpi ne, %1, %c0_i32_0 : i32
    scf.if %2 {
      %cst = arith.constant 0.000000e+00 : f32
      %10 = vector.broadcast %cst : f32 to vector<8x1024xf32>
      %c0_8 = arith.constant 0 : index
      %c0_9 = arith.constant 0 : index
      %11 = vector.load %arg5[%c0_8, %c0_9] : memref<8x1024xf32, #tpu.memory_space<vmem>>, vector<8x1024xf32>
      tpu.vector_store %arg5[%c0_8, %c0_9], %10 {strides = array<i32>} : memref<8x1024xf32, #tpu.memory_space<vmem>>, vector<8x1024xf32>,
    } else {
    }
    %c0 = arith.constant 0 : index
    %c0_1 = arith.constant 0 : index
    %3 = vector.load %arg3[%c0, %c0_1] : memref<8x1024xf32, #tpu.memory_space<vmem>>, vector<8x1024xf32>
    %c0_2 = arith.constant 0 : index
    %c0_3 = arith.constant 0 : index
    %4 = vector.load %arg5[%c0_2, %c0_3] : memref<8x1024xf32, #tpu.memory_space<vmem>>, vector<8x1024xf32>
    %5 = arith.addf %4, %3 : vector<8x1024xf32>
    %c0_4 = arith.constant 0 : index
    %c0_5 = arith.constant 0 : index
    %6 = vector.load %arg5[%c0_4, %c0_5] : memref<8x1024xf32, #tpu.memory_space<vmem>>, vector<8x1024xf32>
    tpu.vector_store %arg5[%c0_4, %c0_5], %5 {strides = array<i32>} : memref<8x1024xf32, #tpu.memory_space<vmem>>, vector<8x1024xf32>,
    %c0_i32_6 = arith.constant 0 : i32
    %7 = arith.cmpi eq, %arg2, %c0_i32_6 : i32
    %8 = arith.extui %7 : i1 to i32
    %c0_i32_7 = arith.constant 0 : i32
    %9 = arith.cmpi ne, %8, %c0_i32_7 : i32
    scf.if %9 {
      %c0_8 = arith.constant 0 : index
      %c0_9 = arith.constant 0 : index
      %10 = vector.load %arg5[%c0_8, %c0_9] : memref<8x1024xf32, #tpu.memory_space<vmem>>, vector<8x1024xf32>
      %cst = arith.constant dense<0.000000e+00> : vector<8xf32>
      %11 = vector.multi_reduction <add>, %10, %cst [1] : vector<8x1024xf32> to vector<8xf32>
      %12 = vector.shape_cast %11 : vector<8xf32> to vector<8x1xf32>
      %cst_10 = arith.constant 9.765625E-4 : f32
      %13 = vector.broadcast %cst_10 : f32 to vector<8x1xf32>
      %14 = arith.mulf %12, %13 : vector<8x1xf32>
      %15 = vector.shape_cast %14 : vector<8x1xf32> to vector<1x8x1xf32>
      %16 = vector.shape_cast %15 : vector<1x8x1xf32> to vector<1x8x1xf32>
      %17 = vector.broadcast %16 : vector<1x8x1xf32> to vector<1x8x128xf32>
      %c0_11 = arith.constant 0 : index
      %c0_12 = arith.constant 0 : index
      %c0_13 = arith.constant 0 : index
      %18 = vector.load %arg4[%c0_11, %c0_12, %c0_13] : memref<1x8x128xf32, #tpu.memory_space<vmem>>, vector<1x8x128xf32>
      tpu.vector_store %arg4[%c0_11, %c0_12, %c0_13], %17 {strides = array<i32>} : memref<1x8x128xf32, #tpu.memory_space<vmem>>, vector<1x8x128xf32>,
    } else {
    }
    return
  }
  func.func @transform_0(%arg0: i32, %arg1: i32, %arg2: i32) -> (i32, i32) {
    %c1_i32 = arith.constant 1 : i32
    %0 = arith.muli %arg1, %c1_i32 : i32
    %1 = arith.addi %0, %arg2 : i32
    %c0_i32 = arith.constant 0 : i32
    %2 = arith.minsi %1, %c0_i32 : i32
    %c0_i32_0 = arith.constant 0 : i32
    return %arg0, %2 : i32, i32
  }
  func.func @transform_1(%arg0: i32, %arg1: i32, %arg2: i32) -> (i32, i32, i32) {
    %c0_i32 = arith.constant 0 : i32
    %c0_i32_0 = arith.constant 0 : i32
    return %arg1, %arg0, %c0_i32 : i32, i32, i32
  }
}

</mosaic_0001>

<bundles_post_ra>
// kernel: _brightness_impl.1
= control target key start
LH: loop header
LB: loop body
LE: loop exit
PB: predicated region body
PF: predicated region fallthrough
CT: control target
= control target key end

     0   :  { %v83_v0 = vlaneseq  ;;  %v217_v1 = vmov 1983009808   ;;  %s255_s0 = inlined_call_operand.vmem [shape: f32[2,1024], index: 0, kind: input, shape index: {}]   ;;  %s256_s1 = inlined_call_operand.vmem [shape: f32[1,8,128], index: 1, kind: output, shape index: {}]  }
   0x1   :  { %v81_v2 = vunpack.c.l.s4 %v217_v1  ;;  %v205_v4 = vld [vmem:[%s255_s0] ss:$16 sps:$4 sm:$0xff]   ;;  %v207_v6 = vld [vmem:[%s255_s0 + $0x4] ss:$16 sps:$4 sm:$0xff]   ;;  %v211_v10 = vld [vmem:[%s255_s0 + $0x8] ss:$16 sps:$4 sm:$0xff]  }
   0x2   :  { %v84_v3 = vshrl.u32 %v83_v0, 7  ;;  %v208_v7 = vld [vmem:[%s255_s0 + $0x20] ss:$16 sps:$4 sm:$0xff]   ;;  %v210_v8 = vld [vmem:[%s255_s0 + $0x24] ss:$16 sps:$4 sm:$0xff]  }
   0x3   :  { %v82_v5 = vunpack.c.0.s8 %v81_v2  ;;  %v214_v11 = vld [vmem:[%s255_s0 + $0x28] ss:$16 sps:$4 sm:$0xff]   ;;  %v213_v20 = vld [vmem:[%s255_s0 + $0xc] ss:$16 sps:$4 sm:$0xff]  }
   0x4   :  { %v216_v21 = vld [vmem:[%s255_s0 + $0x2c] ss:$16 sps:$4 sm:$0xff]  }
   0x5   :  { %v85_v9 = vsub.s32 %v82_v5, %v84_v3 }
   0x7   :  { %v86_v12 = vrot.slane %v205_v4, %v85_v9  ;;  %v93_v13 = vrot.slane %v207_v6, %v85_v9  ;;  %v100_v14 = vrot.slane %v208_v7, %v85_v9  ;;  %v107_v15 = vrot.slane %v210_v8, %v85_v9 }
   0x8   :  { %v122_v16 = vrot.slane %v211_v10, %v85_v9  ;;  %v136_v22 = vrot.slane %v214_v11, %v85_v9  ;;  %v129_v25 = vrot.slane %v213_v20, %v85_v9  ;;  %v143_v26 = vrot.slane %v216_v21, %v85_v9 }
   0x9   :  { %v108_v17 = vcombine.low %v86_v12, %v100_v14  ;;  %v109_v18 = vcombine.high %v86_v12, %v100_v14  ;;  %v110_v19 = vcombine.low %v93_v13, %v107_v15  ;;  %v111_v23 = vcombine.high %v93_v13, %v107_v15 }
   0xa   :  { %v144_v27 = vcombine.low %v122_v16, %v136_v22  ;;  %v145_v29 = vcombine.high %v122_v16, %v136_v22  ;;  %v146_v31 = vcombine.low %v129_v25, %v143_v26  ;;  %v147_v33 = vcombine.high %v129_v25, %v143_v26 }
   0xb   :  { %v183_v24 = vadd.f32 %v109_v18, %v108_v17 }
   0xd   :  { %v184_v28 = vadd.f32 %v183_v24, %v110_v19 }
   0xf   :  { %v185_v30 = vadd.f32 %v184_v28, %v111_v23 }
  0x11   :  { %v186_v32 = vadd.f32 %v185_v30, %v144_v27 }
  0x13   :  { %v187_v34 = vadd.f32 %v186_v32, %v145_v29 }
  0x15   :  { %v188_v35 = vadd.f32 %v187_v34, %v146_v31 }
  0x17   :  { %v189_v36 = vadd.f32 %v188_v35, %v147_v33 }
  0x19   :  { %190 = vadd.xlane.f32.xlu0 %v189_v36 }
  0xa2   :  { %v191_v37 = vpop.xlane.xlu0 %190 }
  0xa3   :  { %v192_v38 = vmul.f32 0.0009765625, %v191_v37 }
  0xa5   :  { %193 = vst [vmem:[%s256_s1] sm:$0xff] %v192_v38 }

</bundles_post_ra>
